<compile_context>
chip_gen: v5e
topology: v5e:2x2
jax: 0.10.0
libtpu: 0.0.40
codegen_flags: <defaults>
</compile_context>

<pallas_src>
import functools

import jax
import jax.numpy as jnp
from jax.experimental import pallas as pl
from jax.experimental.pallas import tpu as pltpu


# ----------------------------------------------------------------------------
# Helpers
# ----------------------------------------------------------------------------
def _round_up(n, m):
    return ((n + m - 1) // m) * m


def _pad2d(a, rows, cols):
    r, c = a.shape
    if r == rows and c == cols:
        return a
    return jnp.pad(a, ((0, rows - r), (0, cols - c)))


def _row_tile(m, tm):
    """Row tile: multiple of 128 for large M, clamped so the grid keeps >= 2
    steps per TensorCore (>= 4 total) on 2-TC chips (v7x) so the 'parallel'
    axis still overlaps DMA with compute on each core; multiple of 8 for
    small M (single grid step)."""
    if m > 4 * 128:
        tm = _round_up(tm, 128)
        per_core = _round_up(pl.cdiv(m, 4), 128)
        return max(128, min(tm, per_core))
    return _round_up(min(m, tm), 8)


def _vmem_limit_bytes(need_bytes):
    """Per-call scoped-VMEM bound from actual buffer sizes (2x margin + fixed
    headroom), floored at the common 32 MiB default and capped below physical
    capacity — avoids blanket large claims that starve surrounding fusions."""
    try:
        cap = int(pltpu.get_tpu_info().vmem_capacity_bytes)
    except Exception:
        cap = 64 * 1024 * 1024
    if cap <= 0:
        cap = 64 * 1024 * 1024
    want = 2 * int(need_bytes) + (8 << 20)
    return int(min(max(want, 32 << 20), int(cap * 0.9)))


def _compiler_params(need_bytes):
    return pltpu.CompilerParams(
        dimension_semantics=("parallel",),
        vmem_limit_bytes=_vmem_limit_bytes(need_bytes),
    )


def _probe_single_buffer():
    """One-time (import-time) capability check for pl.Buffered(1) via AOT
    lower+compile of a tiny dummy kernel — keeps the wrappers trace-safe."""
    def k(x_ref, o_ref):
        o_ref[...] = x_ref[...] * 2.0

    try:
        fn = pl.pallas_call(
            k,
            out_shape=jax.ShapeDtypeStruct((8, 128), jnp.float32),
            grid_spec=pltpu.PrefetchScalarGridSpec(
                num_scalar_prefetch=0,
                grid=(1,),
                in_specs=[pl.BlockSpec((8, 128), lambda i: (0, 0),
                                       pipeline_mode=pl.Buffered(1))],
                out_specs=pl.BlockSpec((8, 128), lambda i: (0, 0)),
            ),
        )
        jax.jit(fn).lower(jax.ShapeDtypeStruct((8, 128), jnp.float32)).compile()
        return True
    except Exception:
        return False


_SINGLE_BUFFER_SUPPORTED = _probe_single_buffer()


def _const_spec(block_shape):
    """BlockSpec for a grid-invariant operand (weights / biases): single VMEM
    buffer when supported (halves resident weight VMEM)."""
    index_map = lambda *_: (0,) * len(block_shape)
    if _SINGLE_BUFFER_SUPPORTED:
        return pl.BlockSpec(block_shape, index_map, pipeline_mode=pl.Buffered(1))
    return pl.BlockSpec(block_shape, index_map)


# ----------------------------------------------------------------------------
# Pallas kernels (weights pre-transposed to (K, N): MXU-native, no relayout)
# ----------------------------------------------------------------------------
def _linear_kernel(x_ref, w_ref, b_ref, o_ref):
    # x: (tm, Kp) bf16, w: (Kp, Np) bf16, b: (1, Np) f32.  f32 MXU accumulation,
    # f32 bias-add on the VPU, store in o_ref.dtype (f32 or bf16).
    y = jnp.dot(x_ref[...], w_ref[...], preferred_element_type=jnp.float32)
    o_ref[...] = (y + b_ref[...]).astype(o_ref.dtype)


def _ffn_kernel(x_ref, w1_ref, b1_ref, w2_ref, b2_ref, o_ref):
    # Fused Feed_Forward_block: relu(x @ W1 + b1) @ W2 + b2 (weights (K, N)).
    h = jnp.dot(x_ref[...], w1_ref[...], preferred_element_type=jnp.float32)
    h = jnp.maximum(h + b1_ref[...], 0.0)            # bias + ReLU in f32 (VPU)
    y = jnp.dot(h.astype(w2_ref.dtype), w2_ref[...],
                preferred_element_type=jnp.float32)
    o_ref[...] = (y + b2_ref[...]).astype(o_ref.dtype)


# ----------------------------------------------------------------------------
# One-time parameter prep (pad / cast / transpose hoisted out of the hot path)
# ----------------------------------------------------------------------------
def prep_linear(w, b, *, compute_dtype=jnp.bfloat16):
    """PyTorch-layout nn.Linear (w: (out, in), b: (out,)) -> padded, transposed
    (Kp, Np) bf16 weight + (1, Np) f32 bias, done once at prep time."""
    d_out, d_in = w.shape
    kp, np_ = _round_up(d_in, 128), _round_up(d_out, 128)
    return {
        "w": _pad2d(jnp.asarray(w, jnp.float32).T, kp, np_).astype(compute_dtype),
        "b": _pad2d(jnp.asarray(b, jnp.float32).reshape(1, -1), 1, np_),
        "d_in": int(d_in),
        "d_out": int(d_out),
    }


# ----------------------------------------------------------------------------
# Pallas wrappers (traceable: no host syncs, no exception-based fallbacks)
# ----------------------------------------------------------------------------
def linear_pallas(x, lin, *, out_dtype=jnp.float32, tm=512,
                  compute_dtype=jnp.bfloat16):
    """y = x @ w.T + b with pre-prepped weights (see prep_linear)."""
    *lead, d_in = x.shape
    assert d_in == lin["d_in"]
    d_out = lin["d_out"]
    wk, bk = lin["w"], lin["b"]
    kp, np_ = wk.shape

    x2d = x.reshape(-1, d_in).astype(compute_dtype)
    m = x2d.shape[0]
    tm_eff = _row_tile(m, tm)
    mp = _round_up(m, tm_eff)
    xk = _pad2d(x2d, mp, kp)

    out_item = jnp.dtype(out_dtype).itemsize
    need = 2 * (wk.size * 2 + bk.size * 4
                + tm_eff * (kp * 2 + np_ * out_item))

    out2d = pl.pallas_call(
        _linear_kernel,
        out_shape=jax.ShapeDtypeStruct((mp, np_), out_dtype),
        grid_spec=pltpu.PrefetchScalarGridSpec(
            num_scalar_prefetch=0,
            grid=(mp // tm_eff,),
            in_specs=[
                pl.BlockSpec((tm_eff, kp), lambda i: (i, 0)),
                _const_spec((kp, np_)),
                _const_spec((1, np_)),
            ],
            out_specs=pl.BlockSpec((tm_eff, np_), lambda i: (i, 0)),
        ),
        compiler_params=_compiler_params(need),
    )(xk, wk, bk)

    # TODO(synk): for directly-consecutive Pallas layers the padded (mp, np_)
    # slab could be handed to the next wrapper as-is instead of slicing here.
    return out2d[:m, :d_out].reshape(*lead, d_out)


def feed_forward_block(x, ffn, *, out_dtype=jnp.float32, tm=512,
                       compute_dtype=jnp.bfloat16):
    """Fused Feed_Forward_block: relu(x @ w1.T + b1) @ w2.T + b2."""
    l1, l2 = ffn["l1"], ffn["l2"]
    *lead, d_in = x.shape
    assert d_in == l1["d_in"] and l1["d_out"] == l2["d_in"]
    d_out = l2["d_out"]
    w1k, b1k, w2k, b2k = l1["w"], l1["b"], l2["w"], l2["b"]
    kp, hp = w1k.shape
    hp2, np_ = w2k.shape
    assert hp == hp2

    x2d = x.reshape(-1, d_in).astype(compute_dtype)
    m = x2d.shape[0]
    tm_eff = _row_tile(m, tm)
    mp = _round_up(m, tm_eff)
    xk = _pad2d(x2d, mp, kp)

    out_item = jnp.dtype(out_dtype).itemsize
    need = 2 * (w1k.size * 2 + w2k.size * 2 + b1k.size * 4 + b2k.size * 4
                + tm_eff * (kp * 2 + hp * 4 + np_ * out_item))

    # TODO(synk): when 2*dp^2 bf16 weights approach VMEM (v7x: 64 MiB), tile
    # W1 over K / W2 over N on an extra 'arbitrary' grid axis with an f32
    # accumulator scratch instead of keeping both weights fully resident.
    out2d = pl.pallas_call(
        _ffn_kernel,
        out_shape=jax.ShapeDtypeStruct((mp, np_), out_dtype),
        grid_spec=pltpu.PrefetchScalarGridSpec(
            num_scalar_prefetch=0,
            grid=(mp // tm_eff,),
            in_specs=[
                pl.BlockSpec((tm_eff, kp), lambda i: (i, 0)),
                _const_spec((kp, hp)),
                _const_spec((1, hp)),
                _const_spec((hp, np_)),
                _const_spec((1, np_)),
            ],
            out_specs=pl.BlockSpec((tm_eff, np_), lambda i: (i, 0)),
        ),
        compiler_params=_compiler_params(need),
    )(xk, w1k, b1k, w2k, b2k)

    return out2d[:m, :d_out].reshape(*lead, d_out)


# ----------------------------------------------------------------------------
# Plain-JAX pieces of LastQuery
# ----------------------------------------------------------------------------
def _jnp_linear(x, w, b):
    return jnp.einsum("...i,oi->...o", x, w) + b


def _jnp_ffn(x, w1, b1, w2, b2):
    return _jnp_linear(jnp.maximum(_jnp_linear(x, w1, b1), 0.0), w2, b2)


def _layer_norm(x, gamma, beta, eps=1e-5):
    mu = jnp.mean(x, axis=-1, keepdims=True)
    var = jnp.mean(jnp.square(x - mu), axis=-1, keepdims=True)
    return (x - mu) * jax.lax.rsqrt(var + eps) * gamma + beta


def _lstm(x, layers, h0, c0):
    # TODO(synk): the LSTM recurrence stays in plain JAX (lax.scan); a Pallas
    # version would need a sequential time grid carrying (h, c) in VMEM scratch.
    out = x
    for l, (w_ih, w_hh, b_ih, b_hh) in enumerate(layers):
        def step(carry, x_t, w_ih=w_ih, w_hh=w_hh, b_ih=b_ih, b_hh=b_hh):
            h, c = carry
            gates = x_t @ w_ih.T + b_ih + h @ w_hh.T + b_hh
            i, f, g, o = jnp.split(gates, 4, axis=-1)    # PyTorch gate order
            i, f, o = jax.nn.sigmoid(i), jax.nn.sigmoid(f), jax.nn.sigmoid(o)
            g = jnp.tanh(g)
            c = f * c + i * g
            h = o * jnp.tanh(c)
            return (h, c), h
        _, ys = jax.lax.scan(step, (h0[l], c0[l]), jnp.swapaxes(out, 0, 1))
        out = jnp.swapaxes(ys, 0, 1)
    return out


def _attention_core(q, k, v, n_heads):
    """Single-query multi-head softmax attention (plain JAX, tiny)."""
    # TODO(synk): the 1xS softmax attention core stays in plain JAX.
    B, S, H = k.shape
    hd = H // n_heads
    qh = q.reshape(B, 1, n_heads, hd).transpose(0, 2, 1, 3).astype(jnp.float32)
    kh = k.reshape(B, S, n_heads, hd).transpose(0, 2, 1, 3).astype(jnp.float32)
    vh = v.reshape(B, S, n_heads, hd).transpose(0, 2, 1, 3).astype(jnp.float32)
    scores = jnp.einsum("bhqd,bhkd->bhqk", qh, kh) / jnp.sqrt(jnp.float32(hd))
    ctx = jnp.einsum("bhqk,bhkd->bhqd", jax.nn.softmax(scores, axis=-1), vh)
    return ctx.transpose(0, 2, 1, 3).reshape(B, 1, H)


# ----------------------------------------------------------------------------
# Parameters
# ----------------------------------------------------------------------------
def _linear_init(key, out_f, in_f):
    kw, kb = jax.random.split(key)
    bound = 1.0 / (in_f ** 0.5)
    w = jax.random.uniform(kw, (out_f, in_f), jnp.float32, -bound, bound)
    b = jax.random.uniform(kb, (out_f,), jnp.float32, -bound, bound)
    return w, b


def init_last_query_params(key, *, hidden_dim, n_layers, n_tests, n_questions,
                           n_tags, n_heads):
    intd = hidden_dim // 3
    keys = iter(jax.random.split(key, 16 + 2 * n_layers))
    p = {
        "hidden_dim": hidden_dim,
        "n_heads": n_heads,
        "n_layers": n_layers,
        "emb_interaction": jax.random.normal(next(keys), (3, intd), jnp.float32),
        "emb_test": jax.random.normal(next(keys), (n_tests + 1, intd), jnp.float32),
        "emb_question": jax.random.normal(next(keys), (n_questions + 1, intd),
                                          jnp.float32),
        "emb_tag": jax.random.normal(next(keys), (n_tags + 1, intd), jnp.float32),
        "comb_proj": _linear_init(next(keys), hidden_dim, intd * 4),
        "query": _linear_init(next(keys), hidden_dim, hidden_dim),
        "key": _linear_init(next(keys), hidden_dim, hidden_dim),
        "value": _linear_init(next(keys), hidden_dim, hidden_dim),
        "attn_in_proj": _linear_init(next(keys), 3 * hidden_dim, hidden_dim),
        "attn_out_proj": _linear_init(next(keys), hidden_dim, hidden_dim),
        "ffn1": _linear_init(next(keys), hidden_dim, hidden_dim),
        "ffn2": _linear_init(next(keys), hidden_dim, hidden_dim),
        "ln1": (jnp.ones((hidden_dim,), jnp.float32),
                jnp.zeros((hidden_dim,), jnp.float32)),
        "ln2": (jnp.ones((hidden_dim,), jnp.float32),
                jnp.zeros((hidden_dim,), jnp.float32)),
        "fc": _linear_init(next(keys), 1, hidden_dim),
    }
    lstm = []
    for _ in range(n_layers):
        w_ih, b_ih = _linear_init(next(keys), 4 * hidden_dim, hidden_dim)
        w_hh, b_hh = _linear_init(next(keys), 4 * hidden_dim, hidden_dim)
        lstm.append((w_ih, w_hh, b_ih, b_hh))
    p["lstm"] = lstm
    return p


def prep_last_query_params(params):
    """One-time prep: compose query/key/value with the MultiheadAttention
    in-projection into a single (3H, H) linear, then pad/transpose/cast every
    Pallas-side weight once (f32 -> bf16, (out,in) -> padded (K,N))."""
    H = params["hidden_dim"]
    w_in, b_in = params["attn_in_proj"]

    def compose(w_outer, b_outer, w_inner, b_inner):
        # outer(inner(x)) = x @ (w_outer @ w_inner)^T + (w_outer @ b_inner + b_outer)
        return w_outer @ w_inner, w_outer @ b_inner + b_outer

    wq, bq = compose(w_in[:H], b_in[:H], *params["query"])
    wk, bk = compose(w_in[H:2 * H], b_in[H:2 * H], *params["key"])
    wv, bv = compose(w_in[2 * H:], b_in[2 * H:], *params["value"])
    w_qkv = jnp.concatenate([wq, wk, wv], axis=0)    # (3H, H) PyTorch layout
    b_qkv = jnp.concatenate([bq, bk, bv], axis=0)

    return {
        "hidden_dim": params["hidden_dim"],
        "n_heads": params["n_heads"],
        "n_layers": params["n_layers"],
        "emb_interaction": params["emb_interaction"],
        "emb_test": params["emb_test"],
        "emb_question": params["emb_question"],
        "emb_tag": params["emb_tag"],
        "comb_proj": prep_linear(*params["comb_proj"]),
        "qkv": prep_linear(w_qkv, b_qkv),
        "out_proj": prep_linear(*params["attn_out_proj"]),
        "ffn": {"l1": prep_linear(*params["ffn1"]),
                "l2": prep_linear(*params["ffn2"])},
        "ln1": params["ln1"],
        "ln2": params["ln2"],
        "fc": params["fc"],
        "lstm": params["lstm"],
    }


# ----------------------------------------------------------------------------
# Forward passes
# ----------------------------------------------------------------------------
def last_query_forward_pallas(p, test, question, tag, correct, mask, interaction):
    """JAX/Pallas port of LastQuery.forward (correct/mask unused, as in PyTorch).
    Fully traceable — wrap in jax.jit."""
    del correct, mask
    H, nh = p["hidden_dim"], p["n_heads"]
    B, S = interaction.shape

    # ModelBase.forward: 4 embeddings -> concat -> comb_proj.
    # TODO(synk): embedding gathers stay in plain JAX (data-dependent gather).
    embed = jnp.concatenate([
        jnp.take(p["emb_interaction"], interaction, axis=0),
        jnp.take(p["emb_test"], test, axis=0),
        jnp.take(p["emb_question"], question, axis=0),
        jnp.take(p["emb_tag"], tag, axis=0),
    ], axis=2)
    X = linear_pallas(embed, p["comb_proj"])                      # (B, S, H) f32

    # Fused (query/key/value ∘ attn in-proj): one pallas_call, N = 3H; bf16
    # output feeds only the tiny attention core + out_proj (halves writeback).
    qkv = linear_pallas(X, p["qkv"], out_dtype=jnp.bfloat16)      # (B, S, 3H)
    q = qkv[:, -1:, :H]                                           # last query only
    k = qkv[:, :, H:2 * H]
    v = qkv[:, :, 2 * H:]

    ctx = _attention_core(q, k, v, nh)                            # (B, 1, H) f32
    attn_out = linear_pallas(ctx, p["out_proj"])                  # (B, 1, H) f32

    out = _layer_norm(X + attn_out, *p["ln1"])                    # broadcast over S
    out = feed_forward_block(out, p["ffn"])                       # fused Pallas FFN
    out = _layer_norm(X + out, *p["ln2"])

    h0 = jnp.zeros((p["n_layers"], B, H), jnp.float32)
    c0 = jnp.zeros((p["n_layers"], B, H), jnp.float32)
    out = _lstm(out, p["lstm"], h0, c0)                           # (B, S, H)

    # Final H -> 1 head in plain JAX: a padded Pallas call would write a
    # (M, 128) f32 block for a (M, 1) result (~128x write amplification).
    out = _jnp_linear(out, *p["fc"])                              # (B, S, 1)
    return jax.nn.sigmoid(out).reshape(B, S)


def last_query_forward_ref(params, test, question, tag, correct, mask, interaction):
    """Pure-jnp f32 reference mirroring the original PyTorch graph exactly."""
    del correct, mask
    H, nh = params["hidden_dim"], params["n_heads"]
    B, S = interaction.shape

    embed = jnp.concatenate([
        jnp.take(params["emb_interaction"], interaction, axis=0),
        jnp.take(params["emb_test"], test, axis=0),
        jnp.take(params["emb_question"], question, axis=0),
        jnp.take(params["emb_tag"], tag, axis=0),
    ], axis=2)
    X = _jnp_linear(embed, *params["comb_proj"])

    q = _jnp_linear(X[:, -1:, :], *params["query"])
    k = _jnp_linear(X, *params["key"])
    v = _jnp_linear(X, *params["value"])
    w_in, b_in = params["attn_in_proj"]
    q = _jnp_linear(q, w_in[:H], b_in[:H])
    k = _jnp_linear(k, w_in[H:2 * H], b_in[H:2 * H])
    v = _jnp_linear(v, w_in[2 * H:], b_in[2 * H:])
    ctx = _attention_core(q, k, v, nh)
    attn_out = _jnp_linear(ctx, *params["attn_out_proj"])

    out = _layer_norm(X + attn_out, *params["ln1"])
    out = _jnp_ffn(out, *params["ffn1"], *params["ffn2"])
    out = _layer_norm(X + out, *params["ln2"])

    h0 = jnp.zeros((params["n_layers"], B, H), jnp.float32)
    c0 = jnp.zeros((params["n_layers"], B, H), jnp.float32)
    out = _lstm(out, params["lstm"], h0, c0)
    out = _jnp_linear(out, *params["fc"])
    return jax.nn.sigmoid(out).reshape(B, S)


# ----------------------------------------------------------------------------
# Demo / self-check
# ----------------------------------------------------------------------------
if __name__ == "__main__":
    batch, seq = 2, 8
    hidden_dim, n_heads, n_layers = 64, 2, 2
    n_tests, n_questions, n_tags = 40, 60, 30

    root = jax.random.PRNGKey(0)
    kp_, kt, kq, kg, kc, ki, kx = jax.random.split(root, 7)

    raw = init_last_query_params(
        kp_, hidden_dim=hidden_dim, n_layers=n_layers, n_tests=n_tests,
        n_questions=n_questions, n_tags=n_tags, n_heads=n_heads)
    prepped = prep_last_query_params(raw)   # one-time weight pad / cast / transpose

    test = jax.random.randint(kt, (batch, seq), 0, n_tests + 1)
    question = jax.random.randint(kq, (batch, seq), 0, n_questions + 1)
    tag = jax.random.randint(kg, (batch, seq), 0, n_tags + 1)
    correct = jax.random.randint(kc, (batch, seq), 0, 2)
    interaction = jax.random.randint(ki, (batch, seq), 0, 3)
    mask = jnp.ones((batch, seq), jnp.int32)

    # (1) Tight check of the fused FFN kernel against a bf16-consistent reference.
    x = jax.random.normal(kx, (batch, seq, hidden_dim), jnp.float32)
    ffn_out = jax.block_until_ready(
        jax.jit(lambda a: feed_forward_block(a, prepped["ffn"]))(x))
    (w1, b1), (w2, b2) = raw["ffn1"], raw["ffn2"]
    bf = lambda a: a.astype(jnp.bfloat16).astype(jnp.float32)
    h_ref = jnp.maximum(jnp.einsum("...i,oi->...o", bf(x), bf(w1)) + b1, 0.0)
    ffn_ref = jnp.einsum("...i,oi->...o", bf(h_ref), bf(w2)) + b2
    assert ffn_out.shape == x.shape
    assert jnp.allclose(ffn_out, ffn_ref, atol=2e-3, rtol=2e-3), \
        float(jnp.max(jnp.abs(ffn_out - ffn_ref)))

    # (2) Full jitted LastQuery forward (Pallas kernels) vs pure-jnp f32 reference
    #     built from the raw (uncomposed) parameters.
    fwd = jax.jit(functools.partial(last_query_forward_pallas, prepped))
    out = jax.block_until_ready(
        fwd(test, question, tag, correct, mask, interaction))
    ref = jax.block_until_ready(
        last_query_forward_ref(raw, test, question, tag, correct, mask,
                               interaction))

    assert out.shape == (batch, seq)
    assert bool(jnp.all(jnp.isfinite(out)))
    assert jnp.allclose(out, ref, atol=5e-2, rtol=5e-2), \
        float(jnp.max(jnp.abs(out - ref)))

    print("KERNEL_OK")
</pallas_src>

<mosaic_0001>
module attributes {stable_mosaic.version = 11 : i64} {
  func.func @_ffn_kernel(%arg0: i32, %arg1: memref<16x128xbf16, #tpu.memory_space<vmem>>, %arg2: memref<128x128xbf16, #tpu.memory_space<vmem>>, %arg3: memref<1x128xf32, #tpu.memory_space<vmem>>, %arg4: memref<128x128xbf16, #tpu.memory_space<vmem>>, %arg5: memref<1x128xf32, #tpu.memory_space<vmem>>, %arg6: memref<16x128xf32, #tpu.memory_space<vmem>>) attributes {dimension_semantics = [#tpu.dimension_semantics<parallel>], iteration_bounds = array<i64: 1>, scalar_prefetch = 0 : i64, scratch_operands = 0 : i64, tpu.core_type = #tpu.core_type<tc>, window_params = [{transform_indices = @transform_0, window_bounds = array<i64: 16, 128>}, {pipeline_mode = #tpu.pipeline_mode<synchronous>, transform_indices = @transform_1, window_bounds = array<i64: 128, 128>}, {pipeline_mode = #tpu.pipeline_mode<synchronous>, transform_indices = @transform_2, window_bounds = array<i64: 1, 128>}, {pipeline_mode = #tpu.pipeline_mode<synchronous>, transform_indices = @transform_3, window_bounds = array<i64: 128, 128>}, {pipeline_mode = #tpu.pipeline_mode<synchronous>, transform_indices = @transform_4, window_bounds = array<i64: 1, 128>}, {transform_indices = @transform_5, window_bounds = array<i64: 16, 128>}]} {
    %c0 = arith.constant 0 : index
    %c0_0 = arith.constant 0 : index
    %0 = vector.load %arg1[%c0, %c0_0] : memref<16x128xbf16, #tpu.memory_space<vmem>>, vector<16x128xbf16>
    %c0_1 = arith.constant 0 : index
    %c0_2 = arith.constant 0 : index
    %1 = vector.load %arg2[%c0_1, %c0_2] : memref<128x128xbf16, #tpu.memory_space<vmem>>, vector<128x128xbf16>
    %cst = arith.constant dense<0.000000e+00> : vector<16x128xf32>
    %2 = tpu.matmul %0, %1, %cst {dimension_numbers = #tpu.dot_dimension_numbers<[1], [0], [0], [1], [0, 0, 1, 1], [], []>} : vector<16x128xbf16>, vector<128x128xbf16>, vector<16x128xf32> -> vector<16x128xf32>
    %c0_3 = arith.constant 0 : index
    %c0_4 = arith.constant 0 : index
    %3 = vector.load %arg3[%c0_3, %c0_4] : memref<1x128xf32, #tpu.memory_space<vmem>>, vector<1x128xf32>
    %4 = vector.broadcast %3 : vector<1x128xf32> to vector<16x128xf32>
    %5 = arith.addf %2, %4 : vector<16x128xf32>
    %cst_5 = arith.constant 0.000000e+00 : f32
    %6 = vector.broadcast %cst_5 : f32 to vector<16x128xf32>
    %7 = arith.maximumf %5, %6 : vector<16x128xf32>
    %8 = arith.truncf %7 : vector<16x128xf32> to vector<16x128xbf16>
    %c0_6 = arith.constant 0 : index
    %c0_7 = arith.constant 0 : index
    %9 = vector.load %arg4[%c0_6, %c0_7] : memref<128x128xbf16, #tpu.memory_space<vmem>>, vector<128x128xbf16>
    %cst_8 = arith.constant dense<0.000000e+00> : vector<16x128xf32>
    %10 = tpu.matmul %8, %9, %cst_8 {dimension_numbers = #tpu.dot_dimension_numbers<[1], [0], [0], [1], [0, 0, 1, 1], [], []>} : vector<16x128xbf16>, vector<128x128xbf16>, vector<16x128xf32> -> vector<16x128xf32>
    %c0_9 = arith.constant 0 : index
    %c0_10 = arith.constant 0 : index
    %11 = vector.load %arg5[%c0_9, %c0_10] : memref<1x128xf32, #tpu.memory_space<vmem>>, vector<1x128xf32>
    %12 = vector.broadcast %11 : vector<1x128xf32> to vector<16x128xf32>
    %13 = arith.addf %10, %12 : vector<16x128xf32>
    %c0_11 = arith.constant 0 : index
    %c0_12 = arith.constant 0 : index
    %14 = vector.load %arg6[%c0_11, %c0_12] : memref<16x128xf32, #tpu.memory_space<vmem>>, vector<16x128xf32>
    tpu.vector_store %arg6[%c0_11, %c0_12], %13 {strides = array<i32>} : memref<16x128xf32, #tpu.memory_space<vmem>>, vector<16x128xf32>,
    return
  }
  func.func @transform_0(%arg0: i32) -> (i32, i32) {
    %c0_i32 = arith.constant 0 : i32
    %c0_i32_0 = arith.constant 0 : i32
    return %arg0, %c0_i32 : i32, i32
  }
  func.func @transform_1(%arg0: i32) -> (i32, i32) {
    %c0_i32 = arith.constant 0 : i32
    %c0_i32_0 = arith.constant 0 : i32
    %c0_i32_1 = arith.constant 0 : i32
    return %c0_i32, %c0_i32_0 : i32, i32
  }
  func.func @transform_2(%arg0: i32) -> (i32, i32) {
    %c0_i32 = arith.constant 0 : i32
    %c0_i32_0 = arith.constant 0 : i32
    %c0_i32_1 = arith.constant 0 : i32
    return %c0_i32, %c0_i32_0 : i32, i32
  }
  func.func @transform_3(%arg0: i32) -> (i32, i32) {
    %c0_i32 = arith.constant 0 : i32
    %c0_i32_0 = arith.constant 0 : i32
    %c0_i32_1 = arith.constant 0 : i32
    return %c0_i32, %c0_i32_0 : i32, i32
  }
  func.func @transform_4(%arg0: i32) -> (i32, i32) {
    %c0_i32 = arith.constant 0 : i32
    %c0_i32_0 = arith.constant 0 : i32
    %c0_i32_1 = arith.constant 0 : i32
    return %c0_i32, %c0_i32_0 : i32, i32
  }
  func.func @transform_5(%arg0: i32) -> (i32, i32) {
    %c0_i32 = arith.constant 0 : i32
    %c0_i32_0 = arith.constant 0 : i32
    return %arg0, %c0_i32 : i32, i32
  }
}

</mosaic_0001>

<bundles_post_ra>
// kernel: _lambda_.1
= control target key start
LH: loop header
LB: loop body
LE: loop exit
PB: predicated region body
PF: predicated region fallthrough
CT: control target
= control target key end

     0   :  { %10 = vsyncpa [#allocation3], 0  ;;  %s433_s0 = inlined_call_operand.vmem [shape: bf16[16,128], index: 0, kind: input, shape index: {}]   ;;  %s434_s1 = inlined_call_operand.hbm [shape: bf16[128,128], index: 1, kind: input, shape index: {}]   ;;  %s435_s2 = inlined_call_operand.vmem [shape: f32[1,128], index: 2, kind: input, shape index: {}]   ;;  %s436_s3 = inlined_call_operand.hbm [shape: bf16[128,128], index: 3, kind: input, shape index: {}]   ;;  %s437_s4 = inlined_call_operand.vmem [shape: f32[1,128], index: 4, kind: input, shape index: {}]   ;;  %s438_s5 = inlined_call_operand.vmem [shape: f32[16,128], index: 5, kind: output, shape index: {}]  }
   0x1   :  { %s18_s20 = sshll.u32 %s434_s1, 4  ;;  %s19_s20 = int_to_ptr.hbm [resolvable:$true] %s18_s20 }
   0x2   :  { %11 = vsyncpa [#allocation5], 0  ;;  %s378_s21 = smov [#allocation2]   ;;  %s33_s25 = sshll.u32 %s436_s3, 4  ;;  %s34_s25 = int_to_ptr.hbm [resolvable:$true] %s33_s25 }
   0x3   :  { %s20_s22 = sshll.u32 %s378_s21, 4  ;;  %s379_s26 = smov 64   ;;  %s21_s22 = int_to_ptr.vmem [resolvable:$true] %s20_s22 }
   0x4   :  { %s380_s27 = smov 4   ;;  %s381_s28 = smov [#allocation4]  }
   0x5   :  { %26 = dma.hbm_to_vmem [thread:$0]  %s19_s20, 1024, %s21_s22, [#allocation3], %s379_s26, %s379_s26, %s380_s27  }
   0x6   :  { %s35_s29 = sshll.u32 %s381_s28, 4  ;;  %s36_s29 = int_to_ptr.vmem [resolvable:$true] %s35_s29 }
   0x7   :  { %41 = dma.hbm_to_vmem [thread:$0]  %s34_s25, 1024, %s36_s29, [#allocation5], %s379_s26, %s379_s26, %s380_s27  }
   0x8   :  { %374 = dma.done.wait [#allocation3], 1024  }
   0x9   :  { %375 = vsyncadd [#allocation3], 4294966272 }
   0xa   :  { %376 = dma.done.wait [#allocation5], 1024  }
   0xb   :  { %377 = vsyncadd [#allocation5], 4294966272  ;;  %v311_v0 = vld [vmem:[#allocation2 + $0x38] sm:$0xff]  ;;  %v310_v1 = vld [vmem:[#allocation2 + $0x30] sm:$0xff] }
   0xc   :  { %128 = vmatpush.bf16.msra.mxu0 %v311_v0  ;;  %v319_v2 = vld [vmem:[#allocation4 + $0x38] sm:$0xff]  ;;  %v318_v3 = vld [vmem:[#allocation4 + $0x30] sm:$0xff]  ;;  %v309_v4 = vld [vmem:[#allocation2 + $0x28] sm:$0xff] }
   0xd   :  { %213 = vmatpush.bf16.msra.mxu1 %v319_v2  ;;  %v317_v5 = vld [vmem:[#allocation4 + $0x28] sm:$0xff]  ;;  %v308_v6 = vld [vmem:[#allocation2 + $0x20] sm:$0xff]  ;;  %v307_v8 = vld [vmem:[#allocation2 + $0x18] sm:$0xff] }
   0xe   :  { %v316_v7 = vld [vmem:[#allocation4 + $0x20] sm:$0xff]  ;;  %v306_v9 = vld [vmem:[#allocation2 + $0x10] sm:$0xff]  ;;  %v305_v10 = vld [vmem:[#allocation2 + $0x8] sm:$0xff] }
   0xf   :  { %v304_v11 = vld [vmem:[#allocation2] sm:$0xff]  ;;  %v315_v13 = vld [vmem:[#allocation4 + $0x18] sm:$0xff]  ;;  %v314_v14 = vld [vmem:[#allocation4 + $0x10] sm:$0xff] }
  0x10   :  { %129 = vmatpush.bf16.msra.mxu0 %v310_v1  ;;  %v303_v12 = vld [vmem:[%s433_s0] sm:$0xff]  ;;  %v313_v15 = vld [vmem:[#allocation4 + $0x8] sm:$0xff] }
  0x11   :  { %214 = vmatpush.bf16.msra.mxu1 %v318_v3  ;;  %v312_v16 = vld [vmem:[#allocation4] sm:$0xff] }
  0x12   :  { %v324_v18 = vld [vmem:[%s435_s2] ss:$0 sm:$0xff] }
  0x13   :  { %v325_v25 = vld [vmem:[%s437_s4] ss:$0 sm:$0xff] }
  0x14   :  { %130 = vmatpush.bf16.msra.mxu0 %v309_v4 }
  0x15   :  { %215 = vmatpush.bf16.msra.mxu1 %v317_v5 }
  0x18   :  { %131 = vmatpush.bf16.msra.mxu0 %v308_v6 }
  0x19   :  { %216 = vmatpush.bf16.msra.mxu1 %v316_v7 }
  0x1c   :  { %132 = vmatpush.bf16.msra.mxu0 %v307_v8 }
  0x1d   :  { %217 = vmatpush.bf16.msra.mxu1 %v315_v13 }
  0x20   :  { %133 = vmatpush.bf16.msra.mxu0 %v306_v9 }
  0x21   :  { %218 = vmatpush.bf16.msra.mxu1 %v314_v14 }
  0x24   :  { %134 = vmatpush.bf16.msra.mxu0 %v305_v10 }
  0x25   :  { %219 = vmatpush.bf16.msra.mxu1 %v313_v15 }
  0x28   :  { %135 = vmatpush.bf16.msra.mxu0 %v304_v11 }
  0x29   :  { %220 = vmatpush.bf16.msra.mxu1 %v312_v16 }
  0x2b   :  { %136 = vmatmul.bf16.vlgmr.msra.gmra.mxu0 %v303_v12 }
  0xa8   :  { %v137_v17 = vpop.f32.mrf.mxu0 }
  0xa9   :  { %v138_v19 = vadd.f32 %v324_v18, %v137_v17 }
  0xab   :  { %v142_v22 = vmax.f32 %v138_v19, 0.0 }
  0xb0   :  { %v139_v20 = vpop.f32.mrf.mxu0 }
  0xb1   :  { %v140_v21 = vadd.f32 %v324_v18, %v139_v20 }
  0xb3   :  { %v143_v23 = vmax.f32 %v140_v21, 0.0 }
  0xb5   :  { %v144_v24 = vpack.c.bf16 %v143_v23, %v142_v22 }
  0xb7   :  { %221 = vmatmul.bf16.vlgmr.msra.gmra.mxu1 %v144_v24 }
 0x134   :  { %v222_v26 = vpop.f32.mrf.mxu1 }
 0x135   :  { %v223_v27 = vadd.f32 %v325_v25, %v222_v26 }
 0x137   :  { %227 = vst [vmem:[%s438_s5] sm:$0xff] %v223_v27 }
 0x13c   :  { %v224_v28 = vpop.f32.mrf.mxu1 }
 0x13d   :  { %v225_v29 = vadd.f32 %v325_v25, %v224_v28 }
 0x13f   :  { %228 = vst [vmem:[%s438_s5 + $0x8] sm:$0xff] %v225_v29 }
 0x140   :  { %233 = vsyncpa [#allocation3], 1 }
 0x141   :  { %234 = vsyncpa [#allocation5], 1 }

</bundles_post_ra>
